<compile_context>
chip_gen: v7x
topology: tpu7x:2x2x1
jax: 0.10.0
libtpu: 0.0.40
codegen_flags: <defaults>
</compile_context>

<pallas_src>
import functools

import jax
import jax.numpy as jnp
from jax.experimental import pallas as pl
from jax.experimental.pallas import tpu as pltpu


def _ihsnn_kernel(num_layers, negative_slope, x_ref, *refs):
    """refs = (W0, b0, ..., W_{L-1}, b_{L-1}, out_ref)

    x_ref : (num_inputs, TILE_B) bf16     -- batch on the lane axis
    hidden W_i : (out_i, in_i)  bf16      -- raw PyTorch nn.Linear layout
    final  W   : (in_last, 1)   bf16      -- pre-transposed column for VPU reduce
    b_i   : (out_i, 1) f32
    out_ref : (2, TILE_B) f32             -- row 0 = logits, row 1 = sigmoid(logits)
    """
    param_refs = refs[: 2 * num_layers]
    out_ref = refs[2 * num_layers]

    # Compute in f32 (bf16 is only the storage/DMA dtype).
    h = x_ref[...].astype(jnp.float32)                      # (num_inputs, TILE_B)

    # Hidden layers: Linear -> (Dropout == identity at eval) -> LeakyReLU(0.01)
    for li in range(num_layers - 1):
        w = param_refs[2 * li][...].astype(jnp.float32)     # (out, in)
        b = param_refs[2 * li + 1][...]                     # (out, 1) f32
        h = jnp.dot(w, h, preferred_element_type=jnp.float32) + b
        h = jnp.maximum(h, negative_slope * h)              # LeakyReLU: mul + max

    # Final Linear (out_features = 1): VPU multiply + sublane reduce, no MXU pass.
    w_last = param_refs[2 * (num_layers - 1)][...].astype(jnp.float32)   # (F_last, 1)
    b_last = param_refs[2 * (num_layers - 1) + 1][...]                   # (1, 1) f32
    logits = jnp.sum(h * w_last, axis=0, keepdims=True) + b_last         # (1, TILE_B)

    # sigmoid(logits) on the EUP: exp + approximate reciprocal.
    # Clamp the exponent so exp() never overflows to inf for very negative logits.
    e = jnp.exp(jnp.minimum(-logits, 60.0))
    probs = pl.reciprocal(1.0 + e, approx=True)

    out_ref[...] = jnp.concatenate([logits, probs], axis=0)  # lane-dense (2, TILE_B) store


def init_ihsnn_params(key, num_inputs, first_layer_features, layer_scalings):
    """PyTorch nn.Linear-style init.  Returns a list of (W[out, in], b[out]) in the
    raw PyTorch layout (uniform(-1/sqrt(fan_in), 1/sqrt(fan_in)))."""
    dims = [num_inputs, first_layer_features]
    nxt = first_layer_features
    for s in layer_scalings:
        nxt = int(nxt / s)
        dims.append(nxt)
    dims.append(1)  # final Linear -> 1

    params = []
    for i in range(len(dims) - 1):
        fan_in, fan_out = dims[i], dims[i + 1]
        key, kw, kb = jax.random.split(key, 3)
        bound = 1.0 / (fan_in ** 0.5)
        w = jax.random.uniform(kw, (fan_out, fan_in), jnp.float32, -bound, bound)
        b = jax.random.uniform(kb, (fan_out,), jnp.float32, -bound, bound)
        params.append((w, b))
    return params


def _prepare_params_for_kernel(params):
    """Convert raw PyTorch-layout params into kernel-layout arrays.

    Hidden weights stay (out, in) but are cast to bf16 (HBM-traffic halving).
    The final weight is pre-transposed to a (in, 1) column (VPU reduce).
    Biases become (out, 1) f32 columns (lane-broadcast inside the kernel).
    """
    num_layers = len(params)
    flat = []
    for li, (w, b) in enumerate(params):
        w = jnp.asarray(w, jnp.float32)
        b = jnp.asarray(b, jnp.float32)
        if li == num_layers - 1:
            assert w.shape[0] == 1, "final layer must have out_features == 1"
            wk = w.T.astype(jnp.bfloat16)           # (in, 1)
        else:
            wk = w.astype(jnp.bfloat16)             # (out, in)
        flat.append(wk)
        flat.append(b.reshape(-1, 1))               # (out, 1) f32
    return flat


def _choose_tile_b(batch, max_tile_b=1024):
    """Batch tile: multiple of 128 (lane-dense output), capped so per-tile VMEM is tiny."""
    b128 = 128 * ((batch + 127) // 128)
    return min(max_tile_b, b128)


def ihsnn_forward(x, params, is_binary=True, negative_slope=0.01, tile_b=None):
    """IHSNN forward via one batch-gridded Pallas TPU kernel.

    x: (B, num_inputs) f32; params: list of (W[out,in], b[out]) PyTorch layout.
    Returns (logits, probs) if is_binary else logits; both (B, 1) f32.
    """
    batch, num_inputs = x.shape
    num_layers = len(params)
    flat_params = _prepare_params_for_kernel(params)

    if tile_b is None:
        tile_b = _choose_tile_b(batch)
    b_pad = tile_b * ((batch + tile_b - 1) // tile_b)

    # Transpose + bf16-cast fuse into a single producer op; batch lands on lanes.
    x_t = jnp.asarray(x, jnp.float32).T.astype(jnp.bfloat16)        # (num_inputs, B)
    if b_pad != batch:
        x_t = jnp.pad(x_t, ((0, 0), (0, b_pad - batch)))

    grid = (b_pad // tile_b,)

    in_specs = [pl.BlockSpec((num_inputs, tile_b), lambda i: (0, i))]
    for p in flat_params:
        # Constant index_map: weights/biases DMA'd once, VMEM-resident across steps.
        in_specs.append(pl.BlockSpec(p.shape, lambda i: (0, 0)))
    out_specs = pl.BlockSpec((2, tile_b), lambda i: (0, i))
    out_shape = jax.ShapeDtypeStruct((2, b_pad), jnp.float32)

    # Advisory cost estimate (helps XLA schedule the custom call in larger graphs).
    layer_dims = [num_inputs] + [w.shape[0] for (w, _) in params]
    flops = 2 * b_pad * sum(layer_dims[i] * layer_dims[i + 1]
                            for i in range(len(layer_dims) - 1))
    bytes_accessed = (x_t.size * 2
                      + sum(int(p.size) * p.dtype.itemsize for p in flat_params)
                      + 2 * b_pad * 4)
    cost = pl.CostEstimate(flops=int(flops), transcendentals=int(b_pad),
                           bytes_accessed=int(bytes_accessed))

    kernel = functools.partial(_ihsnn_kernel, num_layers, negative_slope)

    packed = pl.pallas_call(
        kernel,
        out_shape=out_shape,
        grid=grid,
        in_specs=in_specs,
        out_specs=out_specs,
        compiler_params=pltpu.CompilerParams(dimension_semantics=("parallel",)),
        cost_estimate=cost,
    )(x_t, *flat_params)

    logits = packed[0, :batch][:, None]
    probs = packed[1, :batch][:, None]
    if is_binary:
        return logits, probs
    return logits


def ihsnn_reference(x, params, is_binary=True, negative_slope=0.01):
    """Pure-JAX reference (PyTorch-layout params, eval-mode forward)."""
    h = jnp.asarray(x, jnp.float32)
    for (w, b) in params[:-1]:
        h = h @ w.T + b
        h = jnp.where(h > 0, h, negative_slope * h)
    w, b = params[-1]
    logits = h @ w.T + b
    if is_binary:
        return logits, jax.nn.sigmoid(logits)
    return logits


if __name__ == "__main__":
    key = jax.random.PRNGKey(0)
    k_params, k_data = jax.random.split(key)

    # Small, forward-consistent shapes:
    #   num_inputs=32, first_layer_features=32, layer_scalings=[2, 2]
    #   -> Linear 32->32, 32->16, 16->8, final 8->1
    batch = 8
    num_inputs = 32
    first_layer_features = 32
    layer_scalings = [2, 2]

    params = init_ihsnn_params(k_params, num_inputs, first_layer_features,
                               layer_scalings)
    x = jax.random.normal(k_data, (batch, num_inputs), jnp.float32)

    logits, probs = ihsnn_forward(x, params, is_binary=True)
    jax.block_until_ready(logits)
    jax.block_until_ready(probs)
    assert logits.shape == (batch, 1) and probs.shape == (batch, 1)

    # Reference with the same bf16-rounded x/weights the kernel stores in HBM
    # (biases and all accumulation are f32 in both paths).
    params_bf = [(w.astype(jnp.bfloat16).astype(jnp.float32), b) for (w, b) in params]
    x_bf = x.astype(jnp.bfloat16).astype(jnp.float32)
    ref_logits, ref_probs = ihsnn_reference(x_bf, params_bf, is_binary=True)

    assert jnp.allclose(logits, ref_logits, atol=1e-4, rtol=1e-4)
    # probs use the EUP approximate reciprocal -> compare with a modest tolerance.
    assert jnp.allclose(probs, ref_probs, atol=2e-2, rtol=2e-2)

    print("KERNEL_OK")
</pallas_src>

<mosaic_0001>
module attributes {stable_mosaic.version = 11 : i64} {
  func.func @_ihsnn_kernel(%arg0: i32, %arg1: memref<32x128xbf16, #tpu.memory_space<vmem>>, %arg2: memref<32x32xbf16, #tpu.memory_space<vmem>>, %arg3: memref<32x1xf32, #tpu.memory_space<vmem>>, %arg4: memref<16x32xbf16, #tpu.memory_space<vmem>>, %arg5: memref<16x1xf32, #tpu.memory_space<vmem>>, %arg6: memref<8x16xbf16, #tpu.memory_space<vmem>>, %arg7: memref<8x1xf32, #tpu.memory_space<vmem>>, %arg8: memref<8x1xbf16, #tpu.memory_space<vmem>>, %arg9: memref<1x1xf32, #tpu.memory_space<vmem>>, %arg10: memref<2x128xf32, #tpu.memory_space<vmem>>) attributes {dimension_semantics = [#tpu.dimension_semantics<parallel>], iteration_bounds = array<i64: 1>, scalar_prefetch = 0 : i64, scratch_operands = 0 : i64, tpu.core_type = #tpu.core_type<tc>, window_params = [{transform_indices = @transform_0, window_bounds = array<i64: 32, 128>}, {pipeline_mode = #tpu.pipeline_mode<synchronous>, transform_indices = @transform_1, window_bounds = array<i64: 32, 32>}, {pipeline_mode = #tpu.pipeline_mode<synchronous>, transform_indices = @transform_2, window_bounds = array<i64: 32, 1>}, {pipeline_mode = #tpu.pipeline_mode<synchronous>, transform_indices = @transform_3, window_bounds = array<i64: 16, 32>}, {pipeline_mode = #tpu.pipeline_mode<synchronous>, transform_indices = @transform_4, window_bounds = array<i64: 16, 1>}, {pipeline_mode = #tpu.pipeline_mode<synchronous>, transform_indices = @transform_5, window_bounds = array<i64: 8, 16>}, {pipeline_mode = #tpu.pipeline_mode<synchronous>, transform_indices = @transform_6, window_bounds = array<i64: 8, 1>}, {pipeline_mode = #tpu.pipeline_mode<synchronous>, transform_indices = @transform_7, window_bounds = array<i64: 8, 1>}, {pipeline_mode = #tpu.pipeline_mode<synchronous>, transform_indices = @transform_8, window_bounds = array<i64: 1, 1>}, {transform_indices = @transform_9, window_bounds = array<i64: 2, 128>}]} {
    %c0 = arith.constant 0 : index
    %c0_0 = arith.constant 0 : index
    %0 = vector.load %arg1[%c0, %c0_0] : memref<32x128xbf16, #tpu.memory_space<vmem>>, vector<32x128xbf16>
    %1 = arith.extf %0 : vector<32x128xbf16> to vector<32x128xf32>
    %c0_1 = arith.constant 0 : index
    %c0_2 = arith.constant 0 : index
    %2 = vector.load %arg2[%c0_1, %c0_2] : memref<32x32xbf16, #tpu.memory_space<vmem>>, vector<32x32xbf16>
    %3 = arith.extf %2 : vector<32x32xbf16> to vector<32x32xf32>
    %c0_3 = arith.constant 0 : index
    %c0_4 = arith.constant 0 : index
    %4 = vector.load %arg3[%c0_3, %c0_4] : memref<32x1xf32, #tpu.memory_space<vmem>>, vector<32x1xf32>
    %cst = arith.constant dense<0.000000e+00> : vector<32x128xf32>
    %5 = tpu.matmul %3, %1, %cst {dimension_numbers = #tpu.dot_dimension_numbers<[1], [0], [0], [1], [0, 0, 1, 1], [], []>} : vector<32x32xf32>, vector<32x128xf32>, vector<32x128xf32> -> vector<32x128xf32>
    %6 = vector.broadcast %4 : vector<32x1xf32> to vector<32x128xf32>
    %7 = arith.addf %5, %6 : vector<32x128xf32>
    %cst_5 = arith.constant 0.00999999977 : f32
    %8 = vector.broadcast %cst_5 : f32 to vector<32x128xf32>
    %9 = arith.mulf %8, %7 : vector<32x128xf32>
    %10 = arith.maximumf %7, %9 : vector<32x128xf32>
    %c0_6 = arith.constant 0 : index
    %c0_7 = arith.constant 0 : index
    %11 = vector.load %arg4[%c0_6, %c0_7] : memref<16x32xbf16, #tpu.memory_space<vmem>>, vector<16x32xbf16>
    %12 = arith.extf %11 : vector<16x32xbf16> to vector<16x32xf32>
    %c0_8 = arith.constant 0 : index
    %c0_9 = arith.constant 0 : index
    %13 = vector.load %arg5[%c0_8, %c0_9] : memref<16x1xf32, #tpu.memory_space<vmem>>, vector<16x1xf32>
    %cst_10 = arith.constant dense<0.000000e+00> : vector<16x128xf32>
    %14 = tpu.matmul %12, %10, %cst_10 {dimension_numbers = #tpu.dot_dimension_numbers<[1], [0], [0], [1], [0, 0, 1, 1], [], []>} : vector<16x32xf32>, vector<32x128xf32>, vector<16x128xf32> -> vector<16x128xf32>
    %15 = vector.broadcast %13 : vector<16x1xf32> to vector<16x128xf32>
    %16 = arith.addf %14, %15 : vector<16x128xf32>
    %cst_11 = arith.constant 0.00999999977 : f32
    %17 = vector.broadcast %cst_11 : f32 to vector<16x128xf32>
    %18 = arith.mulf %17, %16 : vector<16x128xf32>
    %19 = arith.maximumf %16, %18 : vector<16x128xf32>
    %c0_12 = arith.constant 0 : index
    %c0_13 = arith.constant 0 : index
    %20 = vector.load %arg6[%c0_12, %c0_13] : memref<8x16xbf16, #tpu.memory_space<vmem>>, vector<8x16xbf16>
    %21 = arith.extf %20 : vector<8x16xbf16> to vector<8x16xf32>
    %c0_14 = arith.constant 0 : index
    %c0_15 = arith.constant 0 : index
    %22 = vector.load %arg7[%c0_14, %c0_15] : memref<8x1xf32, #tpu.memory_space<vmem>>, vector<8x1xf32>
    %cst_16 = arith.constant dense<0.000000e+00> : vector<8x128xf32>
    %23 = tpu.matmul %21, %19, %cst_16 {dimension_numbers = #tpu.dot_dimension_numbers<[1], [0], [0], [1], [0, 0, 1, 1], [], []>} : vector<8x16xf32>, vector<16x128xf32>, vector<8x128xf32> -> vector<8x128xf32>
    %24 = vector.broadcast %22 : vector<8x1xf32> to vector<8x128xf32>
    %25 = arith.addf %23, %24 : vector<8x128xf32>
    %cst_17 = arith.constant 0.00999999977 : f32
    %26 = vector.broadcast %cst_17 : f32 to vector<8x128xf32>
    %27 = arith.mulf %26, %25 : vector<8x128xf32>
    %28 = arith.maximumf %25, %27 : vector<8x128xf32>
    %c0_18 = arith.constant 0 : index
    %c0_19 = arith.constant 0 : index
    %29 = vector.load %arg8[%c0_18, %c0_19] : memref<8x1xbf16, #tpu.memory_space<vmem>>, vector<8x1xbf16>
    %30 = arith.extf %29 : vector<8x1xbf16> to vector<8x1xf32>
    %c0_20 = arith.constant 0 : index
    %c0_21 = arith.constant 0 : index
    %31 = vector.load %arg9[%c0_20, %c0_21] : memref<1x1xf32, #tpu.memory_space<vmem>>, vector<1x1xf32>
    %32 = vector.broadcast %30 : vector<8x1xf32> to vector<8x128xf32>
    %33 = arith.mulf %28, %32 : vector<8x128xf32>
    %cst_22 = arith.constant dense<0.000000e+00> : vector<128xf32>
    %34 = vector.multi_reduction <add>, %33, %cst_22 [0] : vector<8x128xf32> to vector<128xf32>
    %35 = vector.shape_cast %34 : vector<128xf32> to vector<1x128xf32>
    %36 = vector.broadcast %31 : vector<1x1xf32> to vector<1x128xf32>
    %37 = arith.addf %35, %36 : vector<1x128xf32>
    %cst_23 = arith.constant 0.000000e+00 : f32
    %38 = vector.broadcast %cst_23 : f32 to vector<1x128xf32>
    %39 = arith.subf %38, %37 : vector<1x128xf32>
    %cst_24 = arith.constant 6.000000e+01 : f32
    %40 = vector.broadcast %cst_24 : f32 to vector<1x128xf32>
    %41 = arith.minimumf %39, %40 : vector<1x128xf32>
    %42 = math.exp %41 : vector<1x128xf32>
    %cst_25 = arith.constant 1.000000e+00 : f32
    %43 = vector.broadcast %cst_25 : f32 to vector<1x128xf32>
    %44 = arith.addf %43, %42 : vector<1x128xf32>
    %45 = tpu.reciprocal %44 {approx = true} : vector<1x128xf32> -> vector<1x128xf32>
    %46 = tpu.concatenate %37, %45 in 0 : vector<1x128xf32>, vector<1x128xf32> -> vector<2x128xf32>
    %c0_26 = arith.constant 0 : index
    %c0_27 = arith.constant 0 : index
    %47 = vector.load %arg10[%c0_26, %c0_27] : memref<2x128xf32, #tpu.memory_space<vmem>>, vector<2x128xf32>
    tpu.vector_store %arg10[%c0_26, %c0_27], %46 {strides = array<i32>} : memref<2x128xf32, #tpu.memory_space<vmem>>, vector<2x128xf32>,
    return
  }
  func.func @transform_0(%arg0: i32) -> (i32, i32) {
    %c0_i32 = arith.constant 0 : i32
    %c0_i32_0 = arith.constant 0 : i32
    return %c0_i32, %arg0 : i32, i32
  }
  func.func @transform_1(%arg0: i32) -> (i32, i32) {
    %c0_i32 = arith.constant 0 : i32
    %c0_i32_0 = arith.constant 0 : i32
    %c0_i32_1 = arith.constant 0 : i32
    return %c0_i32, %c0_i32_0 : i32, i32
  }
  func.func @transform_2(%arg0: i32) -> (i32, i32) {
    %c0_i32 = arith.constant 0 : i32
    %c0_i32_0 = arith.constant 0 : i32
    %c0_i32_1 = arith.constant 0 : i32
    return %c0_i32, %c0_i32_0 : i32, i32
  }
  func.func @transform_3(%arg0: i32) -> (i32, i32) {
    %c0_i32 = arith.constant 0 : i32
    %c0_i32_0 = arith.constant 0 : i32
    %c0_i32_1 = arith.constant 0 : i32
    return %c0_i32, %c0_i32_0 : i32, i32
  }
  func.func @transform_4(%arg0: i32) -> (i32, i32) {
    %c0_i32 = arith.constant 0 : i32
    %c0_i32_0 = arith.constant 0 : i32
    %c0_i32_1 = arith.constant 0 : i32
    return %c0_i32, %c0_i32_0 : i32, i32
  }
  func.func @transform_5(%arg0: i32) -> (i32, i32) {
    %c0_i32 = arith.constant 0 : i32
    %c0_i32_0 = arith.constant 0 : i32
    %c0_i32_1 = arith.constant 0 : i32
    return %c0_i32, %c0_i32_0 : i32, i32
  }
  func.func @transform_6(%arg0: i32) -> (i32, i32) {
    %c0_i32 = arith.constant 0 : i32
    %c0_i32_0 = arith.constant 0 : i32
    %c0_i32_1 = arith.constant 0 : i32
    return %c0_i32, %c0_i32_0 : i32, i32
  }
  func.func @transform_7(%arg0: i32) -> (i32, i32) {
    %c0_i32 = arith.constant 0 : i32
    %c0_i32_0 = arith.constant 0 : i32
    %c0_i32_1 = arith.constant 0 : i32
    return %c0_i32, %c0_i32_0 : i32, i32
  }
  func.func @transform_8(%arg0: i32) -> (i32, i32) {
    %c0_i32 = arith.constant 0 : i32
    %c0_i32_0 = arith.constant 0 : i32
    %c0_i32_1 = arith.constant 0 : i32
    return %c0_i32, %c0_i32_0 : i32, i32
  }
  func.func @transform_9(%arg0: i32) -> (i32, i32) {
    %c0_i32 = arith.constant 0 : i32
    %c0_i32_0 = arith.constant 0 : i32
    return %c0_i32, %arg0 : i32, i32
  }
}

</mosaic_0001>

<bundles_post_ra>
// kernel: tpu_custom_call.1
= control target key start
LH: loop header
LB: loop body
LE: loop exit
PB: predicated region body
PF: predicated region fallthrough
CT: control target
= control target key end

     0   :  { %s664_s0 = inlined_call_operand.vmem [shape: bf16[32,128], index: 0, kind: input, shape index: {}]   ;;  %s665_s1 = inlined_call_operand.vmem [shape: bf16[32,32], index: 1, kind: input, shape index: {}]   ;;  %s666_s2 = inlined_call_operand.vmem [shape: f32[32,1], index: 2, kind: input, shape index: {}]   ;;  %s667_s3 = inlined_call_operand.vmem [shape: bf16[16,32], index: 3, kind: input, shape index: {}]   ;;  %s668_s4 = inlined_call_operand.vmem [shape: f32[16,1], index: 4, kind: input, shape index: {}]   ;;  %s669_s5 = inlined_call_operand.vmem [shape: bf16[8,16], index: 5, kind: input, shape index: {}]   ;;  %s670_s6 = inlined_call_operand.vmem [shape: f32[8,1], index: 6, kind: input, shape index: {}]   ;;  %s671_s7 = inlined_call_operand.vmem [shape: bf16[8,1], index: 7, kind: input, shape index: {}]   ;;  %s672_s8 = inlined_call_operand.<no memory space> [shape: f32[1,1], index: 8, kind: input, shape index: {}]   ;;  %s673_s9 = inlined_call_operand.hbm [shape: f32[2,128], index: 9, kind: output, shape index: {}]  }
   0x1   :  { %v14_v0 = vstv %s672_s8 }
   0x2   :  { %15 = vst [vmem:[#allocation2] sm:$0x1] %v14_v0 }
   0x3   :  { %v422_v1 = vld [vmem:[%s664_s0] sm:$0xff]   ;;  %v441_v2 = vld [vmem:[%s664_s0 + $0x8] sm:$0xff]   ;;  %vm75_vm0 = vcmask 261120   ;;  %v546_v5 = vmov 0   ;;  %v53_v7 = vld [vmem:[%s666_s2 + $0x10] sm:$0xff] }
   0x4   :  { %v430_v3 = vld [vmem:[%s665_s1] sm:$0xff]   ;;  %493 = vmatprep.subr.bf16.mxu0 %v422_v1  ;;  %516 = vset.pattern.permute.xlu0 %v546_v5  ;;  %v442_v8 = vld [vmem:[%s665_s1 + $0x8] sm:$0xff]  }
   0x5   :  { %v431_v4 = vunpack.c.l.bf16 %v430_v3  ;;  %v51_v6 = vld [vmem:[%s666_s2] sm:$0xff]  ;;  %495 = vmatpush3.bf16.msra.mxu0 %v422_v1  ;;  %v52_v9 = vld [vmem:[%s666_s2 + $0x8] sm:$0xff]  ;;  %517 = vset.pattern.permute.xlu1 %v546_v5 }
   0x6   :  { %57 = vperm.xlu0 %516, %v51_v6   ;;  %497 = vmatprep.subr.bf16.mxu0 %v441_v2 }
   0x7   :  { %468 = vmatprep.mubr.msk.f32.mxu0 %vm75_vm0, %v431_v4 }
   0x8   :  { %16 = vsyncpa [#allocation4], 0  ;;  %v432_v10 = vunpack.c.h.bf16 %v430_v3  ;;  %67 = vperm.xlu1 %517, %v53_v7   ;;  %v435_v11 = vunpack.c.l.bf16 %v442_v8  ;;  %v54_v12 = vld [vmem:[%s666_s2 + $0x18] sm:$0xff]  ;;  %v185_v13 = vld [vmem:[%s668_s4] sm:$0xff]  ;;  %v436_v14 = vunpack.c.h.bf16 %v442_v8  ;;  %v547_v45 = vmov 0.0|0.0  }
   0x9   :  { %499 = vmatpush3.bf16.msra.mxu0 %v441_v2  ;;  %v186_v15 = vld [vmem:[%s668_s4 + $0x8] sm:$0xff]  ;;  %v366_v16 = vld [vmem:[%s671_s7] sm:$0xf]  ;;  %vm548_vm1 = vmmov 0   ;;  %v549_v46 = vmov 0.0   ;;  %vm290_vm2 = vcmask 130048   ;;  %v386_v3 = vlaneseq }
   0xa   :  { %62 = vperm.xlu0 %516, %v52_v9   ;;  %v284_v17 = vld [vmem:[%s670_s6] sm:$0xff]  ;;  %v367_v18 = vunpack.c.l.bf16 %v366_v16  ;;  %vm397_vm3 = vcmask 1040384  }
   0xb   :  { %v368_v19 = vld [vmem:[#allocation2] sm:$0x1]  ;;  %v387_v6 = vshrl.u32 %v386_v3, 7 }
   0xc   :  { %469 = vmatmul.mubr.msk.f32.vlgmr.msra.gmra.mrb[0].mxu0 %vm75_vm0, %v432_v10  ;;  %72 = vperm.xlu1 %517, %v54_v12   ;;  %v438_v20 = vld [vmem:[%s667_s3] sm:$0xff]  }
   0xd   :  { %471 = vmatprep.mubr.msk.f32.mxu0 %vm75_vm0, %v435_v11  ;;  %v439_v21 = vunpack.c.l.bf16 %v438_v20  ;;  %v440_v44 = vunpack.c.h.bf16 %v438_v20  ;;  %v282_v57 = vld [vmem:[%s669_s5] sm:$0xf]  ;;  %v388_v9 = vsub.s32 0, %v387_v6  ;;  %s550_s5 = smov [#allocation3]  }
   0xe   :  { %189 = vperm.xlu0 %516, %v185_v13   ;;  %v283_v59 = vunpack.c.l.bf16 %v282_v57  ;;  %s406_s6 = sshll.u32 %s550_s5, 4  ;;  %s407_s6 = int_to_ptr.vmem [resolvable:$true] %s406_s6 }
   0xf   :  { %482 = vmatprep.mubr.msk.f32.mxu1 %vm75_vm0, %v439_v21  ;;  %s522_s7 = scalar_lea.vmem %s407_s6, 32  ;;  %p527_p1 = scmp.lt.s32.totalorder %s407_s6, %s407_s6 }
  0x10   :  { %472 = vmatmul.mubr.msk.f32.gmra.mrb[2].mxu0 %vm75_vm0, %v436_v14  ;;  %194 = vperm.xlu1 %517, %v186_v15   ;;  %p523_p0 = scmp.ne.s32.totalorder %s407_s6, %s522_s7  ;;  %p528_p2 = scmp.lt.s32.totalorder %s522_s7, %s522_s7 }
  0x12   :  { %287 = vperm.xlu0 %516, %v284_v17   ;;  %p529_p3 = por %p528_p2, %p527_p1 }
  0x14   :  { %371 = vperm.xlu1 %517, %v367_v18   ;;  %p530_p4 = pnand %p529_p3, %p523_p0 }
  0x16   :  { %383 = vperm.xlu0 %516, %v368_v19  }
  0x85   :  { %v58_v22 = vpop.permute.xlu0 %57 }
  0x87   :  { %v68_v23 = vpop.permute.xlu1 %67 }
  0x89   :  { %v63_v24 = vpop.permute.xlu0 %62 }
  0x8b   :  { %v73_v30 = vpop.permute.xlu1 %72 }
  0x8d   :  { %v190_v49 = vpop.permute.xlu0 %189 }
  0x8f   :  { %v195_v47 = vpop.permute.xlu1 %194 }
  0x91   :  { %v288_v60 = vpop.permute.xlu0 %287 }
  0x93   :  { %v372_v2 = vpop.permute.xlu1 %371 }
  0x95   :  { %v384_v11 = vpop.permute.xlu0 %383 }
  0x96   :  { %v389_v13 = vrot.slane %v384_v11, %v388_v9 }
  0xdf   :  { %v470_v25 = vpop.f32.mrb[0].mxu0 }
  0xe0   :  { %v160_v26 = vadd.f32 %v470_v25, %v63_v24  ;;  %v154_v27 = vpop.f32.mrb[1].mxu0 }
  0xe1   :  { %v155_v28 = vadd.f32 %v154_v27, %v58_v22 }
  0xe2   :  { %v174_v29 = vmul.f32 0.01, %v160_v26 }
  0xe3   :  { %v173_v31 = vmul.f32 0.01, %v155_v28  ;;  %v473_v32 = vpop.f32.mrb[2].mxu0 }
  0xe4   :  { %v178_v33 = vmax.f32 %v160_v26, %v174_v29  ;;  %v170_v34 = vadd.f32 %v473_v32, %v73_v30  ;;  %v164_v35 = vpop.f32.mrb[3].mxu0 }
  0xe5   :  { %v177_v36 = vmax.f32 %v155_v28, %v173_v31  ;;  %v165_v37 = vadd.f32 %v164_v35, %v68_v23 }
  0xe6   :  { %v176_v38 = vmul.f32 0.01, %v170_v34 }
  0xe7   :  { %v175_v39 = vmul.f32 0.01, %v165_v37  ;;  %v500_v40 = vpack.c.bf16 %v178_v33, %v177_v36 }
  0xe8   :  { %v180_v41 = vmax.f32 %v170_v34, %v176_v38 }
  0xe9   :  { %v179_v42 = vmax.f32 %v165_v37, %v175_v39  ;;  %501 = vmatprep.subr.bf16.mxu1 %v500_v40 }
  0xea   :  { %503 = vmatpush3.bf16.msra.mxu1 %v500_v40 }
  0xeb   :  { %v504_v43 = vpack.c.bf16 %v180_v41, %v179_v42 }
  0xed   :  { %505 = vmatprep.subr.bf16.mxu1 %v504_v43 }
  0xee   :  { %507 = vmatpush3.bf16.msra.mxu1 %v504_v43 }
  0xef   :  { %508 = vmatprep.subr.bf16.mxu1 %v547_v45 }
  0xf1   :  { %483 = vmatmul.mubr.msk.f32.vlgmr.msra.gmra.mrb[0].mxu1 %vm75_vm0, %v440_v44 }
  0xf2   :  { %489 = vmatprep.mubr.msk.f32.mxu1 %vm548_vm1, %v549_v46 }
 0x1c4   :  { %v484_v48 = vpop.f32.mrb[0].mxu1 }
 0x1c5   :  { %v275_v50 = vadd.f32 %v484_v48, %v195_v47  ;;  %v269_v51 = vpop.f32.mrb[1].mxu1 }
 0x1c6   :  { %v270_v52 = vadd.f32 %v269_v51, %v190_v49 }
 0x1c7   :  { %v279_v53 = vmul.f32 0.01, %v275_v50 }
 0x1c8   :  { %v278_v54 = vmul.f32 0.01, %v270_v52 }
 0x1c9   :  { %v281_v55 = vmax.f32 %v275_v50, %v279_v53 }
 0x1ca   :  { %v280_v56 = vmax.f32 %v270_v52, %v278_v54 }
 0x1cc   :  { %v509_v58 = vpack.c.bf16 %v281_v55, %v280_v56 }
 0x1ce   :  { %510 = vmatpush3.bf16.msra.mxu1 %v509_v58 }
 0x1d1   :  { %490 = vmatmul.mubr.msk.f32.vlgmr.msra.gmra.mrb[2].mxu1 %vm290_vm2, %v283_v59 }
 0x2a4   :  { %v360_v61 = vpop.f32.mrb[2].mxu1 }
 0x2a5   :  { %v361_v62 = vadd.f32 %v360_v61, %v288_v60  ;;  %v491_v63 = vpop.f32.mrb[3].mxu1 }
 0x2a7   :  { %v364_v0 = vmul.f32 0.01, %v361_v62 }
 0x2a9   :  { %v365_v1 = vmax.f32 %v361_v62, %v364_v0 }
 0x2ab   :  { %v374_v4 = vmul.f32 %v372_v2, %v365_v1 }
 0x2ad   :  { %v375_v5 = vrot.slane %v374_v4, 4 }
 0x2af   :  { %v376_v7 = vadd.f32 %v375_v5, %v374_v4 }
 0x2b1   :  { %v377_v8 = vrot.slane %v376_v7, 2 }
 0x2b3   :  { %v378_v10 = vadd.f32 %v377_v8, %v376_v7 }
 0x2b5   :  { %v379_v12 = vrot.slane %v378_v10, 1 }
 0x2b7   :  { %v380_v14 = vadd.f32 %v379_v12, %v378_v10 }
 0x2b9   :  { %v390_v15 = vadd.f32 %v389_v13, %v380_v14 }
 0x2bb   :  { %v391_v16 = vsub.f32 0.0, %v390_v15 }
 0x2bd   :  { %v392_v17 = vmin.f32 %v391_v16, 60.0 }
 0x2bf   :  { %v393_v18 = vmul.f32 1.442695, %v392_v17 }
 0x2c1   :  { %518 = vpow2.f32 %v393_v18 }
 0x2cb   :  { %v519_v19 = vpop.eup %518 }
 0x2cc   :  { %v395_v20 = vadd.f32 1.0, %v519_v19 }
 0x2ce   :  { %520 = vrcp.f32 %v395_v20 }
 0x2d8   :  { %v521_v21 = vpop.eup %520 }
 0x2d9   :  { %v398_v22 = vsel %vm397_vm3, %v390_v15, %v521_v21 }
 0x2da   :  { %399 = vst [vmem:[#allocation3] sm:$0x3] %v398_v22 }
 0x2db   :  { %533 = shalt.err (!%p530_p4)
}
 0x2dc   :  { %s534_s14 = scalar_lea.hbm %s673_s9, 32 }
 0x2dd   :  { %p535_p5 = scmp.ne.s32.totalorder %s673_s9, %s534_s14  ;;  %p538_p6 = scmp.lt.u32.totalorder %s534_s14, %s673_s9 }
 0x2df   :  { %p540_p7 = pnand %p538_p6, %p535_p5 }
 0x2e1   :  { %543 = shalt.err (!%p540_p7)
}
 0x2e2   :  { %409 = dma.vmem_to_hbm [thread:$0]  %s407_s6, 32, %s673_s9, [#allocation4]  }
 0x2e3   :  { %544 = dma.done.wait [#allocation4], 32  }
 0x2e4   :  { %545 = vsyncadd [#allocation4], 4294967264 }
 0x2e5   :  { %413 = vsyncpa [#allocation4], 1 }

</bundles_post_ra>
